<compile_context>
chip_gen: v7x
topology: tpu7x:2x2x1
jax: 0.10.0
libtpu: 0.0.40
codegen_flags: <defaults>
</compile_context>

<pallas_src>
import math
import numpy as np
import jax
import jax.numpy as jnp
from jax.experimental import pallas as pl
from jax.experimental.pallas import tpu as pltpu

NUM_FEATURES = 3
NUM_QUBITS = 3
NUM_CLASSES = 1
SEED = 42
DIM = 2 ** NUM_QUBITS  # 8


# ---------------- parameter setup (plain numpy / JAX glue) ----------------

def structured_init(num_params, seed):
    """Replicates QuantumParameterInitializer.structured_init under np.random.seed(seed)."""
    np.random.seed(seed)
    init_params = []
    num_layers = max(3, num_params // 3)
    params_per_layer = max(1, num_params // num_layers)
    remaining = num_params
    layer_size = min(params_per_layer, remaining)
    init_params.extend(np.random.uniform(-0.05, 0.05, layer_size) * np.pi)
    remaining -= layer_size
    for i in range(1, num_layers - 1):
        if remaining <= 0:
            break
        scale = 0.1 + 0.4 * (i / (num_layers - 1))
        layer_size = min(params_per_layer, remaining)
        init_params.extend(np.random.uniform(-scale, scale, layer_size) * np.pi)
        remaining -= layer_size
    if remaining > 0:
        init_params.extend(np.random.uniform(-0.7, 0.7, remaining) * np.pi)
    return np.array(init_params, dtype=np.float64)


def _ry(theta):
    c, s = np.cos(theta / 2.0), np.sin(theta / 2.0)
    return np.array([[c, -s], [s, c]], dtype=np.float64)


def _single_qubit(gate, q):
    ops = [np.eye(2), np.eye(2), np.eye(2)]
    ops[q] = gate
    # qubit 0 is the least-significant bit of the basis index (Qiskit convention)
    return np.kron(np.kron(ops[2], ops[1]), ops[0])


def _cx(ctrl, tgt):
    U = np.zeros((DIM, DIM), dtype=np.float64)
    for b in range(DIM):
        b2 = b ^ (1 << tgt) if (b >> ctrl) & 1 else b
        U[b2, b] = 1.0
    return U


def build_ansatz_unitary(thetas):
    """TwoLocal(3, ['ry'], 'cx', 'linear', reps=2): a real orthogonal 8x8 matrix.
    (Transpile to u3/cx only changes global phase -> measurement probs unchanged.)"""
    gates = []
    t = list(thetas)
    for _rep in range(2):
        for q in range(NUM_QUBITS):
            gates.append(_single_qubit(_ry(t.pop(0)), q))
        gates.append(_cx(0, 1))
        gates.append(_cx(1, 2))
    for q in range(NUM_QUBITS):
        gates.append(_single_qubit(_ry(t.pop(0)), q))
    U = np.eye(DIM)
    for g in gates:
        U = g @ U
    return U


def parity_bucket_matrix():
    """S[b, parity_mapping(b)] = 1; parity_mapping formats b MSB-first ('0{n}b')."""
    S = np.zeros((DIM, 2), dtype=np.float64)
    for b in range(DIM):
        bits = format(b, f"0{NUM_QUBITS}b")  # string position 0 == qubit (n-1)
        weighted = sum(int(bit) * (i + 1) for i, bit in enumerate(bits))
        S[b, weighted % 2] = 1.0
    return S


def init_classifier(seed):
    """Deterministic xavier_uniform(gain=1.4) for Linear(2, num_classes), bias = 0.1."""
    fan_in, fan_out = 2, NUM_CLASSES
    bound = 1.4 * math.sqrt(6.0 / (fan_in + fan_out))
    key = jax.random.PRNGKey(seed + 1)
    w = jax.random.uniform(key, (NUM_CLASSES, 2), minval=-bound, maxval=bound,
                           dtype=jnp.float32)
    b = jnp.full((NUM_CLASSES,), 0.1, dtype=jnp.float32)
    return w, b


def build_phase_matrix():
    """Constant (8,8) matrix M s.t.
       phi[b] = M[b] @ [x0, x1, x2, (pi-x0)(pi-x1), (pi-x1)(pi-x2), 0, 0, 0]
    reproduces the ZZFeatureMap(reps=1, linear) diagonal phases. The factor 2 of every
    phase term is folded into M (entries are exactly 0 or 2)."""
    M = np.zeros((DIM, DIM), dtype=np.float64)
    for b in range(DIM):
        b0, b1, b2 = b & 1, (b >> 1) & 1, (b >> 2) & 1
        M[b, 0], M[b, 1], M[b, 2] = 2.0 * b0, 2.0 * b1, 2.0 * b2
        M[b, 3] = 2.0 * (b0 ^ b1)
        M[b, 4] = 2.0 * (b1 ^ b2)
        # columns 5..7 stay zero (match the zero rows of the feature slab)
    return M


def build_epilogue_row(bucket_np, w_np, b_np):
    """v_row[c, b] = (1/8) * (S @ W.T)[b, c] + bias_c/8, shaped (NUM_CLASSES, 8).

    Exact fold of parity bucketing + Linear(2,1): probabilities enter un-normalized
    (cos^2+sin^2 summed over 8 basis states == 8, preserved by the orthogonal ansatz),
    so y = v_row @ probs_unscaled == (probs @ S) @ W.T + bias."""
    v = bucket_np @ w_np.T / DIM + b_np.reshape(1, NUM_CLASSES) / DIM  # (8, C)
    return np.ascontiguousarray(v.T)                                    # (C, 8)


# ---------------- Pallas kernel (hot path) ----------------

def qnn_kernel(x_ref, m_ref, u_ref, v_ref, out_ref, t_ref):
    tb = x_ref.shape[1]
    pi = jnp.float32(np.pi)
    x = x_ref[...]                                      # (3, TB)  batch in lanes
    p0 = pi - x[0:1, :]
    p1 = pi - x[1:2, :]
    p2 = pi - x[2:3, :]

    # (8, TB) phase-feature slab (scratch, rewritten fully every step -> megacore-safe).
    t_ref[0:3, :] = x
    t_ref[3:4, :] = p0 * p1
    t_ref[4:5, :] = p1 * p2
    t_ref[5:8, :] = jnp.zeros((3, tb), jnp.float32)     # keep MXU RHS finite

    # ZZFeatureMap phases via one small MXU dot (exact f32 passes).
    phi = jnp.dot(m_ref[...], t_ref[...],
                  preferred_element_type=jnp.float32,
                  precision=jax.lax.Precision.HIGHEST)  # (8, TB)

    # un-normalized statevector (global 1/sqrt(8) folded into the epilogue constant)
    re = jnp.cos(phi)
    im = jnp.sin(phi)

    # TwoLocal ansatz (real orthogonal 8x8): two MXU dots, no concat/slice VMEM copies.
    re2 = jnp.dot(u_ref[...], re, preferred_element_type=jnp.float32,
                  precision=jax.lax.Precision.HIGHEST)
    im2 = jnp.dot(u_ref[...], im, preferred_element_type=jnp.float32,
                  precision=jax.lax.Precision.HIGHEST)
    probs = re2 * re2 + im2 * im2                        # (8, TB) un-normalized probs

    # parity buckets + Linear(2,1) folded into a (1,8)@(8,TB) MXU dot -> lane-dense store.
    out_ref[...] = jnp.dot(v_ref[...], probs,
                           preferred_element_type=jnp.float32,
                           precision=jax.lax.Precision.HIGHEST)   # (1, TB)


def quantum_neural_network(x, m_phase, u_ansatz, v_epilogue, *, tb=16384, min_grid_steps=2):
    """x: (B, 3) f32. Returns squeezed (B,) classifier output (scalar if B == 1)."""
    bsz = x.shape[0]
    b_ceil = int(pl.cdiv(bsz, 128) * 128)               # lane-dense multiple of 128
    tb = int(min(tb, b_ceil))
    # Keep >= 2 grid steps for v7x megacore sharding when the batch is large enough.
    if b_ceil // tb < min_grid_steps and b_ceil >= min_grid_steps * 128:
        tb = int(pl.cdiv(b_ceil // min_grid_steps, 128) * 128)
    b_pad = int(pl.cdiv(bsz, tb) * tb)

    # TODO(synk): produce x in (3, B) layout upstream to avoid this HBM-bound transpose/pad.
    x_t = jnp.transpose(x.astype(jnp.float32))           # (3, B)  batch -> lanes
    if b_pad != bsz:
        x_t = jnp.pad(x_t, ((0, 0), (0, b_pad - bsz)))

    out = pl.pallas_call(
        qnn_kernel,
        out_shape=jax.ShapeDtypeStruct((1, b_pad), jnp.float32),
        grid=(b_pad // tb,),
        in_specs=[
            pl.BlockSpec((NUM_FEATURES, tb), lambda i: (0, i)),    # batch-tiled input
            pl.BlockSpec((DIM, DIM), lambda i: (0, 0)),            # phase matrix (constant)
            pl.BlockSpec((DIM, DIM), lambda i: (0, 0)),            # ansatz (constant)
            pl.BlockSpec((NUM_CLASSES, DIM), lambda i: (0, 0)),    # epilogue row (constant)
        ],
        out_specs=pl.BlockSpec((1, tb), lambda i: (0, i)),         # lane-dense store
        scratch_shapes=[pltpu.VMEM((DIM, tb), jnp.float32)],       # phase-feature slab
        compiler_params=pltpu.CompilerParams(
            dimension_semantics=("parallel",),
            vmem_limit_bytes=32 * 1024 * 1024),
    )(x_t, m_phase, u_ansatz, v_epilogue)

    y = out[0, :bsz]                                     # (B,)
    return y.squeeze()                                   # matches torch .squeeze()


# ---------------- pure-numpy reference (sanity check) ----------------

def reference(x_np, u_ansatz, bucket_np, w_np, b_np):
    b0 = (np.arange(DIM) & 1).astype(np.float64)
    b1 = ((np.arange(DIM) >> 1) & 1).astype(np.float64)
    b2 = ((np.arange(DIM) >> 2) & 1).astype(np.float64)
    x0, x1, x2 = x_np[:, 0:1], x_np[:, 1:2], x_np[:, 2:3]
    phi = (2 * x0 * b0 + 2 * x1 * b1 + 2 * x2 * b2
           + 2 * (np.pi - x0) * (np.pi - x1) * np.abs(b0 - b1)
           + 2 * (np.pi - x1) * (np.pi - x2) * np.abs(b1 - b2))
    psi = (1.0 / np.sqrt(DIM)) * np.exp(1j * phi)
    psi2 = psi @ u_ansatz.T
    probs = np.abs(psi2) ** 2
    q = probs @ bucket_np
    return (q @ w_np.T + b_np).squeeze()


if __name__ == "__main__":
    # Trainable ansatz params: 3 qubits * (reps=2 + 1 final) rotation layers = 9
    thetas = structured_init(NUM_QUBITS * 3, SEED)
    u_ansatz_np = build_ansatz_unitary(thetas)
    bucket_np = parity_bucket_matrix()
    w, b = init_classifier(SEED)
    w_np = np.asarray(w, dtype=np.float64)
    b_np = np.asarray(b, dtype=np.float64)

    m_phase = jnp.asarray(build_phase_matrix(), dtype=jnp.float32)            # (8, 8)
    u_ansatz = jnp.asarray(u_ansatz_np, dtype=jnp.float32)                    # (8, 8)
    v_epilogue = jnp.asarray(build_epilogue_row(bucket_np, w_np, b_np),
                             dtype=jnp.float32)                               # (1, 8)

    key = jax.random.PRNGKey(0)

    # small batch (single grid step)
    batch = 8
    x = jax.random.uniform(key, (batch, NUM_FEATURES), dtype=jnp.float32,
                           minval=0.0, maxval=1.0)
    y = jax.block_until_ready(quantum_neural_network(x, m_phase, u_ansatz, v_epilogue))
    ref = reference(np.asarray(x, dtype=np.float64), u_ansatz_np, bucket_np, w_np, b_np)
    if not np.allclose(np.asarray(y), ref, atol=2e-2, rtol=2e-2):
        raise AssertionError(f"mismatch (batch={batch}): pallas={np.asarray(y)} ref={ref}")

    # larger batch: exercises the multi-step ("parallel") grid + padding path
    batch2 = 300
    x2 = jax.random.uniform(jax.random.PRNGKey(1), (batch2, NUM_FEATURES),
                            dtype=jnp.float32, minval=0.0, maxval=1.0)
    y2 = jax.block_until_ready(quantum_neural_network(x2, m_phase, u_ansatz, v_epilogue))
    ref2 = reference(np.asarray(x2, dtype=np.float64), u_ansatz_np, bucket_np, w_np, b_np)
    if not np.allclose(np.asarray(y2), ref2, atol=2e-2, rtol=2e-2):
        raise AssertionError(f"mismatch (batch={batch2})")

    print("KERNEL_OK")
</pallas_src>

<mosaic_0001>
module attributes {stable_mosaic.version = 11 : i64} {
  func.func @qnn_kernel(%arg0: i32, %arg1: memref<3x128xf32, #tpu.memory_space<vmem>>, %arg2: memref<8x8xf32, #tpu.memory_space<vmem>>, %arg3: memref<8x8xf32, #tpu.memory_space<vmem>>, %arg4: memref<1x8xf32, #tpu.memory_space<vmem>>, %arg5: memref<1x128xf32, #tpu.memory_space<vmem>>, %arg6: memref<8x128xf32, #tpu.memory_space<vmem>>) attributes {dimension_semantics = [#tpu.dimension_semantics<parallel>], iteration_bounds = array<i64: 1>, scalar_prefetch = 0 : i64, scratch_operands = 1 : i64, tpu.core_type = #tpu.core_type<tc>, window_params = [{transform_indices = @transform_0, window_bounds = array<i64: 3, 128>}, {pipeline_mode = #tpu.pipeline_mode<synchronous>, transform_indices = @transform_1, window_bounds = array<i64: 8, 8>}, {pipeline_mode = #tpu.pipeline_mode<synchronous>, transform_indices = @transform_2, window_bounds = array<i64: 8, 8>}, {pipeline_mode = #tpu.pipeline_mode<synchronous>, transform_indices = @transform_3, window_bounds = array<i64: 1, 8>}, {transform_indices = @transform_4, window_bounds = array<i64: 1, 128>}]} {
    %c0 = arith.constant 0 : index
    %c0_0 = arith.constant 0 : index
    %0 = vector.load %arg1[%c0, %c0_0] : memref<3x128xf32, #tpu.memory_space<vmem>>, vector<3x128xf32>
    %1 = vector.extract_strided_slice %0 {offsets = [0, 0], sizes = [1, 128], strides = [1, 1]} : vector<3x128xf32> to vector<1x128xf32>
    %cst = arith.constant 3.14159274 : f32
    %2 = vector.broadcast %cst : f32 to vector<1x128xf32>
    %3 = arith.subf %2, %1 : vector<1x128xf32>
    %4 = vector.extract_strided_slice %0 {offsets = [1, 0], sizes = [1, 128], strides = [1, 1]} : vector<3x128xf32> to vector<1x128xf32>
    %cst_1 = arith.constant 3.14159274 : f32
    %5 = vector.broadcast %cst_1 : f32 to vector<1x128xf32>
    %6 = arith.subf %5, %4 : vector<1x128xf32>
    %7 = vector.extract_strided_slice %0 {offsets = [2, 0], sizes = [1, 128], strides = [1, 1]} : vector<3x128xf32> to vector<1x128xf32>
    %cst_2 = arith.constant 3.14159274 : f32
    %8 = vector.broadcast %cst_2 : f32 to vector<1x128xf32>
    %9 = arith.subf %8, %7 : vector<1x128xf32>
    %c0_3 = arith.constant 0 : index
    %c0_4 = arith.constant 0 : index
    %10 = vector.load %arg6[%c0_3, %c0_4] : memref<8x128xf32, #tpu.memory_space<vmem>>, vector<3x128xf32>
    tpu.vector_store %arg6[%c0_3, %c0_4], %0 {strides = array<i32>} : memref<8x128xf32, #tpu.memory_space<vmem>>, vector<3x128xf32>,
    %11 = arith.mulf %3, %6 : vector<1x128xf32>
    %c3 = arith.constant 3 : index
    %c0_5 = arith.constant 0 : index
    %12 = vector.load %arg6[%c3, %c0_5] : memref<8x128xf32, #tpu.memory_space<vmem>>, vector<1x128xf32>
    tpu.vector_store %arg6[%c3, %c0_5], %11 {strides = array<i32>} : memref<8x128xf32, #tpu.memory_space<vmem>>, vector<1x128xf32>,
    %13 = arith.mulf %6, %9 : vector<1x128xf32>
    %c4 = arith.constant 4 : index
    %c0_6 = arith.constant 0 : index
    %14 = vector.load %arg6[%c4, %c0_6] : memref<8x128xf32, #tpu.memory_space<vmem>>, vector<1x128xf32>
    tpu.vector_store %arg6[%c4, %c0_6], %13 {strides = array<i32>} : memref<8x128xf32, #tpu.memory_space<vmem>>, vector<1x128xf32>,
    %cst_7 = arith.constant 0.000000e+00 : f32
    %15 = vector.broadcast %cst_7 : f32 to vector<3x128xf32>
    %c5 = arith.constant 5 : index
    %c0_8 = arith.constant 0 : index
    %16 = vector.load %arg6[%c5, %c0_8] : memref<8x128xf32, #tpu.memory_space<vmem>>, vector<3x128xf32>
    tpu.vector_store %arg6[%c5, %c0_8], %15 {strides = array<i32>} : memref<8x128xf32, #tpu.memory_space<vmem>>, vector<3x128xf32>,
    %c0_9 = arith.constant 0 : index
    %c0_10 = arith.constant 0 : index
    %17 = vector.load %arg2[%c0_9, %c0_10] : memref<8x8xf32, #tpu.memory_space<vmem>>, vector<8x8xf32>
    %c0_11 = arith.constant 0 : index
    %c0_12 = arith.constant 0 : index
    %18 = vector.load %arg6[%c0_11, %c0_12] : memref<8x128xf32, #tpu.memory_space<vmem>>, vector<8x128xf32>
    %cst_13 = arith.constant dense<0.000000e+00> : vector<8x128xf32>
    %19 = tpu.matmul %17, %18, %cst_13 {dimension_numbers = #tpu.dot_dimension_numbers<[1], [0], [0], [1], [0, 0, 1, 1], [], []>, precision = #tpu.contract_precision<fp32>} : vector<8x8xf32>, vector<8x128xf32>, vector<8x128xf32> -> vector<8x128xf32>
    %20 = math.cos %19 : vector<8x128xf32>
    %21 = math.sin %19 : vector<8x128xf32>
    %c0_14 = arith.constant 0 : index
    %c0_15 = arith.constant 0 : index
    %22 = vector.load %arg3[%c0_14, %c0_15] : memref<8x8xf32, #tpu.memory_space<vmem>>, vector<8x8xf32>
    %cst_16 = arith.constant dense<0.000000e+00> : vector<8x128xf32>
    %23 = tpu.matmul %22, %20, %cst_16 {dimension_numbers = #tpu.dot_dimension_numbers<[1], [0], [0], [1], [0, 0, 1, 1], [], []>, precision = #tpu.contract_precision<fp32>} : vector<8x8xf32>, vector<8x128xf32>, vector<8x128xf32> -> vector<8x128xf32>
    %c0_17 = arith.constant 0 : index
    %c0_18 = arith.constant 0 : index
    %24 = vector.load %arg3[%c0_17, %c0_18] : memref<8x8xf32, #tpu.memory_space<vmem>>, vector<8x8xf32>
    %cst_19 = arith.constant dense<0.000000e+00> : vector<8x128xf32>
    %25 = tpu.matmul %24, %21, %cst_19 {dimension_numbers = #tpu.dot_dimension_numbers<[1], [0], [0], [1], [0, 0, 1, 1], [], []>, precision = #tpu.contract_precision<fp32>} : vector<8x8xf32>, vector<8x128xf32>, vector<8x128xf32> -> vector<8x128xf32>
    %26 = arith.mulf %23, %23 : vector<8x128xf32>
    %27 = arith.mulf %25, %25 : vector<8x128xf32>
    %28 = arith.addf %26, %27 : vector<8x128xf32>
    %c0_20 = arith.constant 0 : index
    %c0_21 = arith.constant 0 : index
    %29 = vector.load %arg4[%c0_20, %c0_21] : memref<1x8xf32, #tpu.memory_space<vmem>>, vector<1x8xf32>
    %cst_22 = arith.constant dense<0.000000e+00> : vector<1x128xf32>
    %30 = tpu.matmul %29, %28, %cst_22 {dimension_numbers = #tpu.dot_dimension_numbers<[1], [0], [0], [1], [0, 0, 1, 1], [], []>, precision = #tpu.contract_precision<fp32>} : vector<1x8xf32>, vector<8x128xf32>, vector<1x128xf32> -> vector<1x128xf32>
    %c0_23 = arith.constant 0 : index
    %c0_24 = arith.constant 0 : index
    %31 = vector.load %arg5[%c0_23, %c0_24] : memref<1x128xf32, #tpu.memory_space<vmem>>, vector<1x128xf32>
    tpu.vector_store %arg5[%c0_23, %c0_24], %30 {strides = array<i32>} : memref<1x128xf32, #tpu.memory_space<vmem>>, vector<1x128xf32>,
    return
  }
  func.func @transform_0(%arg0: i32) -> (i32, i32) {
    %c0_i32 = arith.constant 0 : i32
    %c0_i32_0 = arith.constant 0 : i32
    return %c0_i32, %arg0 : i32, i32
  }
  func.func @transform_1(%arg0: i32) -> (i32, i32) {
    %c0_i32 = arith.constant 0 : i32
    %c0_i32_0 = arith.constant 0 : i32
    %c0_i32_1 = arith.constant 0 : i32
    return %c0_i32, %c0_i32_0 : i32, i32
  }
  func.func @transform_2(%arg0: i32) -> (i32, i32) {
    %c0_i32 = arith.constant 0 : i32
    %c0_i32_0 = arith.constant 0 : i32
    %c0_i32_1 = arith.constant 0 : i32
    return %c0_i32, %c0_i32_0 : i32, i32
  }
  func.func @transform_3(%arg0: i32) -> (i32, i32) {
    %c0_i32 = arith.constant 0 : i32
    %c0_i32_0 = arith.constant 0 : i32
    %c0_i32_1 = arith.constant 0 : i32
    return %c0_i32, %c0_i32_0 : i32, i32
  }
  func.func @transform_4(%arg0: i32) -> (i32, i32) {
    %c0_i32 = arith.constant 0 : i32
    %c0_i32_0 = arith.constant 0 : i32
    return %c0_i32, %arg0 : i32, i32
  }
}

</mosaic_0001>

<bundles_post_ra>
// kernel: tpu_custom_call.1
= control target key start
LH: loop header
LB: loop body
LE: loop exit
PB: predicated region body
PF: predicated region fallthrough
CT: control target
= control target key end

     0   :  { %9 = vsyncpa [#allocation4], 0  ;;  %s2612_s0 = inlined_call_operand.hbm [shape: f32[3,128], index: 0, kind: input, shape index: {}]   ;;  %s2613_s1 = inlined_call_operand.hbm [shape: f32[8,8], index: 1, kind: input, shape index: {}]   ;;  %s2614_s2 = inlined_call_operand.hbm [shape: f32[8,8], index: 2, kind: input, shape index: {}]   ;;  %s2615_s3 = inlined_call_operand.vmem [shape: f32[1,8], index: 3, kind: input, shape index: {}]   ;;  %s2616_s4 = inlined_call_operand.hbm [shape: f32[1,128], index: 4, kind: output, shape index: {}]  }
   0x1   :  { %10 = vsyncpa [#allocation7], 0 }
   0x2   :  { %11 = vsyncpa [#allocation5], 0  ;;  %s2418_s15 = smov [#allocation6]   ;;  %s2419_s17 = smov [#allocation3]  }
   0x3   :  { %s28_s16 = sshll.u32 %s2418_s15, 4  ;;  %s18_s18 = sshll.u32 %s2419_s17, 4  ;;  %s29_s16 = int_to_ptr.vmem [resolvable:$true] %s28_s16  ;;  %s19_s18 = int_to_ptr.vmem [resolvable:$true] %s18_s18 }
   0x4   :  { %s2324_s21 = scalar_lea.hbm %s2613_s1, 128 }
   0x5   :  { %p2325_p0 = scmp.ne.s32.totalorder %s2613_s1, %s2324_s21  ;;  %p2328_p1 = scmp.lt.u32.totalorder %s2324_s21, %s2613_s1 }
   0x7   :  { %p2330_p2 = pnand %p2328_p1, %p2325_p0 }
   0x9   :  { %2333 = shalt.err (!%p2330_p2)
}
   0xa   :  { %s2334_s26 = scalar_lea.vmem %s29_s16, 128  ;;  %p2339_p4 = scmp.lt.s32.totalorder %s29_s16, %s29_s16 }
   0xb   :  { %p2335_p3 = scmp.ne.s32.totalorder %s29_s16, %s2334_s26  ;;  %p2340_p5 = scmp.lt.s32.totalorder %s2334_s26, %s2334_s26 }
   0xd   :  { %p2341_p6 = por %p2340_p5, %p2339_p4 }
   0xf   :  { %p2342_p7 = pnand %p2341_p6, %p2335_p3 }
  0x11   :  { %2345 = shalt.err (!%p2342_p7)
}
  0x12   :  { %31 = dma.hbm_to_vmem [thread:$0]  %s2613_s1, 128, %s29_s16, [#allocation7]  }
  0x13   :  { %s2346_s5 = scalar_lea.hbm %s2612_s0, 64 }
  0x14   :  { %p2347_p8 = scmp.ne.s32.totalorder %s2612_s0, %s2346_s5  ;;  %p2350_p9 = scmp.lt.u32.totalorder %s2346_s5, %s2612_s0 }
  0x16   :  { %p2352_p10 = pnand %p2350_p9, %p2347_p8 }
  0x18   :  { %2355 = shalt.err (!%p2352_p10)
}
  0x19   :  { %s2356_s10 = scalar_lea.vmem %s19_s18, 64  ;;  %p2361_p12 = scmp.lt.s32.totalorder %s19_s18, %s19_s18 }
  0x1a   :  { %p2357_p11 = scmp.ne.s32.totalorder %s19_s18, %s2356_s10  ;;  %p2362_p13 = scmp.lt.s32.totalorder %s2356_s10, %s2356_s10 }
  0x1c   :  { %p2363_p0 = por %p2362_p13, %p2361_p12 }
  0x1e   :  { %p2364_p1 = pnand %p2363_p0, %p2357_p11 }
  0x20   :  { %2367 = shalt.err (!%p2364_p1)
}
  0x21   :  { %21 = dma.hbm_to_vmem [thread:$0]  %s2612_s0, 64, %s19_s18, [#allocation4]  }
  0x22   :  { %s2420_s12 = smov [#allocation8]   ;;  %s2368_s16 = scalar_lea.hbm %s2614_s2, 128 }
  0x23   :  { %s38_s13 = sshll.u32 %s2420_s12, 4  ;;  %p2369_p2 = scmp.ne.s32.totalorder %s2614_s2, %s2368_s16  ;;  %s39_s13 = int_to_ptr.vmem [resolvable:$true] %s38_s13 }
  0x24   :  { %p2372_p3 = scmp.lt.u32.totalorder %s2368_s16, %s2614_s2 }
  0x26   :  { %p2374_p4 = pnand %p2372_p3, %p2369_p2 }
  0x28   :  { %2377 = shalt.err (!%p2374_p4)
}
  0x29   :  { %s2378_s22 = scalar_lea.vmem %s39_s13, 128  ;;  %p2383_p6 = scmp.lt.s32.totalorder %s39_s13, %s39_s13 }
  0x2a   :  { %p2379_p5 = scmp.ne.s32.totalorder %s39_s13, %s2378_s22  ;;  %p2384_p7 = scmp.lt.s32.totalorder %s2378_s22, %s2378_s22 }
  0x2c   :  { %p2385_p8 = por %p2384_p7, %p2383_p6 }
  0x2e   :  { %p2386_p9 = pnand %p2385_p8, %p2379_p5 }
  0x30   :  { %2389 = shalt.err (!%p2386_p9)
}
  0x31   :  { %41 = dma.hbm_to_vmem [thread:$0]  %s2614_s2, 128, %s39_s13, [#allocation7]  }
  0x32   :  { %2412 = dma.done.wait [#allocation4], 64  }
  0x33   :  { %2413 = vsyncadd [#allocation4], 4294967232 }
  0x34   :  { %2414 = dma.done.wait [#allocation7], 256  }
  0x35   :  { %2415 = vsyncadd [#allocation7], 4294967040  ;;  %v2421_v0 = vmov 0.0   ;;  %vm2422_vm0 = vmmov 0   ;;  %vm65_vm1 = vcmask 64512   ;;  %v63_v2 = vld [vmem:[#allocation6] sm:$0xff] }
  0x36   :  { %62 = vst [vmem:[#allocation2 + $0x5] sm:$0x7] %v2421_v0  ;;  %2144 = vmatprep.subr.mxu0 %v2421_v0  ;;  %2146 = vmatprep.mubr.msk.f32.mxu0 %vm2422_vm0, %v2421_v0  ;;  %v53_v1 = vld [vmem:[#allocation3] sm:$0x7]  ;;  %v67_v4 = vsel %vm65_vm1, %v63_v2, 0 }
  0x37   :  { %2174 = vmatprep.subr.mxu1 %v2421_v0  ;;  %2176 = vmatprep.mubr.msk.f32.mxu1 %vm2422_vm0, %v2421_v0  ;;  %v54_v3 = vsub.f32 3.1415927, %v53_v1  ;;  %55 = vst [vmem:[#allocation2] sm:$0x7] %v53_v1  ;;  %v135_v5 = vand.u32 4294901760, %v67_v4 }
  0x38   :  { %v2423_v30 = vmov 683565275   ;;  %v2424_v32 = vmov 2475754826   ;;  %v2425_v35 = vmov 2131351028  }
  0x39   :  { %v57_v6 = vrot.slane %v54_v3, 1  ;;  %v136_v7 = vsub.f32 %v67_v4, %v135_v5  ;;  %v2426_v38 = vmov 2102212464   ;;  %v2427_v41 = vmov 920167782  }
  0x3a   :  { %v2428_v44 = vmov 1326507024  }
  0x3b   :  { %v59_v8 = vmul.f32 %v57_v6, %v54_v3  ;;  %v137_v9 = vand.u32 4294901760, %v136_v7 }
  0x3d   :  { %60 = vst [vmem:[#allocation2 + $0x3] sm:$0x3] %v59_v8   ;;  %v138_v10 = vsub.f32 %v136_v7, %v137_v9 }
  0x3f   :  { %v139_v12 = vand.u32 4294901760, %v138_v10 }
  0x44   :  { %v64_v11 = vld [vmem:[#allocation2] sm:$0xff] }
  0x45   :  { %v70_v13 = vand.u32 4294901760, %v64_v11 }
  0x47   :  { %2145 = vmatpush3.msra.mxu0 %v70_v13  ;;  %v147_v14 = vsub.f32 %v64_v11, %v70_v13 }
  0x48   :  { %2147 = vmatmul.mubr.f32.vlgmr.msra.gmra.mrb[0].mxu0 %v139_v12  ;;  %2149 = vmatprep.subr.mxu0 %v2421_v0 }
  0x49   :  { %v148_v15 = vand.u32 4294901760, %v147_v14  ;;  %2151 = vmatprep.mubr.msk.f32.mxu0 %vm2422_vm0, %v2421_v0 }
  0x4b   :  { %v149_v16 = vsub.f32 %v147_v14, %v148_v15 }
  0x4d   :  { %v150_v17 = vand.u32 4294901760, %v149_v16 }
  0x4f   :  { %2150 = vmatpush3.msra.mxu0 %v150_v17 }
  0x50   :  { %2152 = vmatmul.mubr.f32.vlgmr.msra.gmra.mrb[0].mxu0 %v135_v5  ;;  %2154 = vmatprep.subr.mxu0 %v2421_v0 }
  0x51   :  { %2155 = vmatpush3.msra.mxu0 %v147_v14  ;;  %2156 = vmatprep.mubr.msk.f32.mxu0 %vm2422_vm0, %v2421_v0 }
  0x52   :  { %2159 = vmatprep.subr.mxu0 %v2421_v0 }
  0x58   :  { %2157 = vmatmul.mubr.f32.vlgmr.msra.gmra.mrb[0].mxu0 %v136_v7 }
  0x59   :  { %2160 = vmatpush3.msra.mxu0 %v70_v13  ;;  %2161 = vmatprep.mubr.msk.f32.mxu0 %vm2422_vm0, %v2421_v0 }
  0x5a   :  { %2164 = vmatprep.subr.mxu0 %v2421_v0 }
  0x60   :  { %2162 = vmatmul.mubr.f32.vlgmr.msra.gmra.mrb[0].mxu0 %v137_v9 }
  0x61   :  { %2165 = vmatpush3.msra.mxu0 %v148_v15  ;;  %2166 = vmatprep.mubr.msk.f32.mxu0 %vm2422_vm0, %v2421_v0 }
  0x62   :  { %2169 = vmatprep.subr.mxu0 %v2421_v0 }
  0x68   :  { %2167 = vmatmul.mubr.f32.vlgmr.msra.gmra.mrb[0].mxu0 %v135_v5 }
  0x69   :  { %2170 = vmatpush3.msra.mxu0 %v70_v13  ;;  %2171 = vmatprep.mubr.msk.f32.mxu0 %vm2422_vm0, %v2421_v0 }
  0x6a   :  { %2204 = vmatprep.subr.mxu0 %v2421_v0 }
  0x70   :  { %2172 = vmatmul.mubr.f32.vlgmr.msra.gmra.mrb[0].mxu0 %v135_v5 }
  0x71   :  { %2206 = vmatprep.mubr.msk.f32.mxu0 %vm2422_vm0, %v2421_v0 }
 0x143   :  { %v2517_v18 = vpop.f32.mrb[0].mxu0 }
 0x144   :  { %v518_v19 = vand.u32 2139095040, %v2517_v18  ;;  %v2173_v20 = vpop.f32.mrb[1].mxu0  ;;  %v515_v24 = vand.u32 2147483647, %v2517_v18  ;;  %vm517_vm9 = vcmp.lt.s32.totalorder %v2517_v18, 0 }
 0x146   :  { %v519_v21 = vshrl.u32 %v518_v19, 23  ;;  %v522_v27 = vand.u32 8388607, %v515_v24  ;;  %vm516_vm10 = vcmp.le.f32.partialorder %v515_v24, 0.7853982 }
 0x148   :  { %v2088_v22 = vadd.s32 4294967169, %v519_v21  ;;  %v523_v46 = vor.u32 8388608, %v522_v27 }
 0x14a   :  { %v525_v23 = vadd.s32 1, %v2088_v22  ;;  %v563_v60 = vshll.u32 %v523_v46, 8 }
 0x14c   :  { %vm526_vm2 = vcmp.gt.s32.totalorder %v525_v23, 0 }
 0x14d   :  { %v527_v25 = vsel %vm526_vm2, %v525_v23, 0 }
 0x14e   :  { %v529_v26 = vand.u32 31, %v527_v25  ;;  %v528_v29 = vshrl.u32 %v527_v25, 5 }
 0x150   :  { %v530_v28 = vsub.s32 32, %v529_v26  ;;  %v532_v31 = vshll.u32 %v2423_v30, %v529_v26  ;;  %v535_v33 = vshll.u32 %v2424_v32, %v529_v26  ;;  %v538_v37 = vshll.u32 %v2425_v35, %v529_v26 }
 0x151   :  { %v541_v40 = vshll.u32 %v2426_v38, %v529_v26  ;;  %v544_v43 = vshll.u32 %v2427_v41, %v529_v26  ;;  %vm547_vm3 = vcmp.lt.s32.totalorder %v528_v29, 1  ;;  %vm550_vm4 = vcmp.lt.s32.totalorder %v528_v29, 4 }
 0x152   :  { %v533_v34 = vshrl.u32 %v2424_v32, %v530_v28  ;;  %v536_v36 = vshrl.u32 %v2425_v35, %v530_v28  ;;  %v539_v39 = vshrl.u32 %v2426_v38, %v530_v28  ;;  %v542_v42 = vshrl.u32 %v2427_v41, %v530_v28  ;;  %v722_v35 = vld [vmem:[#allocation8] sm:$0xff] }
 0x153   :  { %v545_v45 = vshrl.u32 %v2428_v44, %v530_v28  ;;  %v531_v55 = vshrl.u32 %v2423_v30, %v530_v28  ;;  %vm549_vm5 = vcmp.lt.s32.totalorder %v528_v29, 3  ;;  %vm548_vm6 = vcmp.lt.s32.totalorder %v528_v29, 2 }
 0x154   :  { %v534_v47 = vor.u32 %v533_v34, %v532_v31  ;;  %v537_v48 = vor.u32 %v536_v36, %v535_v33  ;;  %v540_v49 = vor.u32 %v539_v39, %v538_v37  ;;  %v543_v50 = vor.u32 %v542_v42, %v541_v40 }
 0x155   :  { %v546_v51 = vor.u32 %v545_v45, %v544_v43  ;;  %v724_v37 = vsel %vm65_vm1, %v722_v35, 0 }
 0x156   :  { %v552_v52 = vsel %vm550_vm4, %v540_v49, 2102212464  ;;  %v555_v53 = vsel %vm547_vm3, %v534_v47, %v537_v48  ;;  %v559_v54 = vsel %vm547_vm3, %v537_v48, %v540_v49  ;;  %v556_v56 = vsel %vm550_vm4, %v543_v50, 920167782 }
 0x157   :  { %v560_v57 = vsel %vm550_vm4, %v546_v51, 1326507024  ;;  %v557_v58 = vsel %vm549_vm5, %v540_v49, %v556_v56  ;;  %v551_v61 = vsel %vm547_vm3, %v531_v55, %v534_v47  ;;  %v553_v62 = vsel %vm549_vm5, %v537_v48, %v552_v52 }
 0x158   :  { %v561_v59 = vsel %vm549_vm5, %v543_v50, %v560_v57  ;;  %v558_v63 = vsel %vm548_vm6, %v555_v53, %v557_v58  ;;  %v554_v6 = vsel %vm548_vm6, %v551_v61, %v553_v62  ;;  %v2538_v41 = vand.u32 4294901760, %v724_v37 }
 0x159   :  { %v562_v1 = vsel %vm548_vm6, %v559_v54, %v561_v59  ;;  %v2526_v4 = vmul.u32.u64.low %v563_v60, %v558_v63  ;;  %v2527_v5 = vmul.u32.u64.high %v563_v60, %v558_v63, %v2526_v4  ;;  %v570_v8 = vmul.u32 %v563_v60, %v554_v6 }
 0x15a   :  { %v2523_v2 = vmul.u32.u64.low %v563_v60, %v562_v1  ;;  %v2524_v3 = vmul.u32.u64.high %v563_v60, %v562_v1, %v2523_v2  ;;  %v793_v44 = vsub.f32 %v724_v37, %v2538_v41  ;;  %vm607_vm3 = vweird.f32 %v2517_v18 }
 0x15b   :  { %v573_v7 = vadd.s32 1, %v2527_v5 }
 0x15c   :  { %vm572_vm7 = vc.u32 %v2524_v3, %v2526_v4  ;;  %v571_v21 = vadd.s32 %v2526_v4, %v2524_v3  ;;  %v794_v47 = vand.u32 4294901760, %v793_v44 }
 0x15d   :  { %v574_v9 = vsel %vm572_vm7, %v573_v7, %v2527_v5  ;;  %v1621_v7 = vld [vmem:[%s2615_s3] sm:$0x1]  ;;  %s2429_s3 = smov [#allocation9]  }
 0x15e   :  { %v575_v10 = vadd.s32 %v574_v9, %v570_v8  ;;  %v795_v24 = vsub.f32 %v793_v44, %v794_v47  ;;  %v1623_v8 = vsel %vm65_vm1, %v1621_v7, 0  ;;  %s2078_s24 = sshll.u32 %s2429_s3, 4  ;;  %s2079_s24 = int_to_ptr.vmem [resolvable:$true] %s2078_s24 }
 0x15f   :  { %v1691_v9 = vand.u32 4294901760, %v1623_v8  ;;  %s2390_s25 = scalar_lea.vmem %s2079_s24, 16  ;;  %s2394_s26 = scalar_lea.vmem %s2079_s24, 32 }
 0x160   :  { %v576_v11 = vadd.s32 536870912, %v575_v10  ;;  %v796_v60 = vand.u32 4294901760, %v795_v24  ;;  %p2391_p10 = scmp.ne.s32.totalorder %s2079_s24, %s2390_s25  ;;  %p2395_p11 = scmp.lt.s32.totalorder %s2079_s24, %s2079_s24 }
 0x161   :  { %p2396_p12 = scmp.lt.s32.totalorder %s2394_s26, %s2390_s25 }
 0x162   :  { %v577_v12 = vshrl.u32 %v576_v11, 30 }
 0x163   :  { %p2397_p13 = por %p2396_p12, %p2395_p11 }
 0x164   :  { %v578_v13 = vshll.u32 %v577_v12, 30  ;;  %v601_v34 = vsub.s32 4, %v577_v12 }
 0x165   :  { %p2398_p0 = pnand %p2397_p13, %p2391_p10 }
 0x166   :  { %v579_v14 = vsub.s32 %v575_v10, %v578_v13  ;;  %v602_v39 = vsel %vm517_vm9, %v601_v34, %v577_v12  ;;  %v1692_v10 = vsub.f32 %v1623_v8, %v1691_v9 }
 0x167   :  { %v604_v42 = vsel %vm516_vm10, 0, %v602_v39 }
 0x168   :  { %v581_v15 = vsub.s32 0, %v579_v14  ;;  %v711_v43 = vadd.s32 3, %v604_v42  ;;  %v608_v45 = vand.u32 3, %v604_v42  ;;  %v1693_v11 = vand.u32 4294901760, %v1692_v10 }
 0x16a   :  { %v2089_v16 = vmin.u32 %v581_v15, %v579_v14  ;;  %v712_v46 = vand.u32 3, %v711_v43  ;;  %vm613_vm11 = vcmp.eq.s32.totalorder %v608_v45, 2  ;;  %vm610_vm13 = vcmp.eq.s32.totalorder %v608_v45, 0 }
 0x16b   :  { %vm609_vm15 = vcmp.lt.s32.totalorder %v608_v45, 2 }
 0x16c   :  { %v583_v17 = vclz %v2089_v16  ;;  %vm717_vm12 = vcmp.eq.s32.totalorder %v712_v46, 2  ;;  %vm714_vm14 = vcmp.eq.s32.totalorder %v712_v46, 0  ;;  %vm713_vm2 = vcmp.lt.s32.totalorder %v712_v46, 2 }
 0x16d   :  { %v1694_v16 = vsub.f32 %v1692_v10, %v1693_v11 }
 0x16e   :  { %v2090_v19 = vadd.s32 4294967294, %v583_v17 }
 0x170   :  { %vm2091_vm8 = vcmp.lt.s32.totalorder %v2090_v19, 0 }
 0x171   :  { %v586_v20 = vsel %vm2091_vm8, 0, %v2090_v19 }
 0x172   :  { %v587_v22 = vsub.s32 32, %v586_v20  ;;  %v591_v23 = vsub.s32 4294967266, %v586_v20  ;;  %v588_v25 = vshll.u32 %v579_v14, %v586_v20 }
 0x174   :  { %v589_v26 = vshrl.u32 %v571_v21, %v587_v22  ;;  %v592_v27 = vadd.s32 127, %v591_v23  ;;  %v1695_v21 = vand.u32 4294901760, %v1694_v16 }
 0x176   :  { %v590_v28 = vor.u32 %v589_v26, %v588_v25  ;;  %v593_v29 = vshll.u32 %v592_v27, 23 }
 0x178   :  { %v594_v30 = vor.u32 4788187, %v593_v29  ;;  %v597_v32 = vcvt.s32.f32 %v590_v28 }
 0x17a   :  { %v595_v31 = vand.u32 2147483647, %v594_v30 }
 0x17c   :  { %v598_v33 = vmul.f32 %v597_v32, %v595_v31 }
 0x17e   :  { %v599_v36 = vxor.u32 2147483648, %v598_v33 }
 0x180   :  { %v600_v38 = vsel %vm517_vm9, %v599_v36, %v598_v33 }
 0x181   :  { %v603_v40 = vsel %vm516_vm10, %v2517_v18, %v600_v38 }
 0x182   :  { %2320 = vcosq.f32 %v603_v40 }
 0x183   :  { %2322 = vsinq.f32 %v603_v40 }
 0x18c   :  { %v2321_v48 = vpop.eup %2320 }
 0x18d   :  { %v2323_v49 = vpop.eup %2322  ;;  %v614_v50 = vxor.u32 2147483648, %v2321_v48 }
 0x18e   :  { %v611_v51 = vxor.u32 2147483648, %v2323_v49 }
 0x18f   :  { %v615_v52 = vsel %vm613_vm11, %v614_v50, %v2323_v49  ;;  %v719_v53 = vsel %vm717_vm12, %v614_v50, %v2323_v49 }
 0x190   :  { %v612_v54 = vsel %vm610_vm13, %v2321_v48, %v611_v51  ;;  %v716_v55 = vsel %vm714_vm14, %v2321_v48, %v611_v51 }
 0x191   :  { %v616_v56 = vsel %vm609_vm15, %v612_v54, %v615_v52  ;;  %v720_v57 = vsel %vm713_vm2, %v716_v55, %v719_v53 }
 0x192   :  { %v617_v58 = vsel %vm607_vm3, nan, %v616_v56  ;;  %v721_v59 = vsel %vm607_vm3, nan, %v720_v57 }
 0x193   :  { %v727_v61 = vand.u32 4294901760, %v617_v58  ;;  %v1173_v62 = vand.u32 4294901760, %v721_v59 }
 0x195   :  { %2175 = vmatpush3.msra.mxu1 %v727_v61  ;;  %v804_v63 = vsub.f32 %v617_v58, %v727_v61  ;;  %2205 = vmatpush3.msra.mxu0 %v1173_v62  ;;  %v1250_v1 = vsub.f32 %v721_v59, %v1173_v62 }
 0x196   :  { %2177 = vmatmul.mubr.f32.vlgmr.msra.gmra.mrb[0].mxu1 %v796_v60  ;;  %2207 = vmatmul.mubr.f32.vlgmr.msra.gmra.mrb[2].mxu0 %v796_v60 }
 0x197   :  { %2179 = vmatprep.subr.mxu1 %v2421_v0  ;;  %2209 = vmatprep.subr.mxu0 %v2421_v0  ;;  %v805_v2 = vand.u32 4294901760, %v804_v63  ;;  %v1251_v3 = vand.u32 4294901760, %v1250_v1 }
 0x198   :  { %2181 = vmatprep.mubr.msk.f32.mxu1 %vm2422_vm0, %v2421_v0  ;;  %2211 = vmatprep.mubr.msk.f32.mxu0 %vm2422_vm0, %v2421_v0 }
 0x199   :  { %v806_v18 = vsub.f32 %v804_v63, %v805_v2  ;;  %v1252_v4 = vsub.f32 %v1250_v1, %v1251_v3 }
 0x19b   :  { %v807_v5 = vand.u32 4294901760, %v806_v18  ;;  %v1253_v6 = vand.u32 4294901760, %v1252_v4 }
 0x19d   :  { %2180 = vmatpush3.msra.mxu1 %v807_v5  ;;  %2210 = vmatpush3.msra.mxu0 %v1253_v6 }
 0x19e   :  { %2182 = vmatmul.mubr.f32.vlgmr.msra.gmra.mrb[0].mxu1 %v2538_v41  ;;  %2184 = vmatprep.subr.mxu1 %v2421_v0 }
 0x19f   :  { %2212 = vmatmul.mubr.f32.vlgmr.msra.gmra.mrb[2].mxu0 %v2538_v41  ;;  %2214 = vmatprep.subr.mxu0 %v2421_v0 }
 0x1a0   :  { %2185 = vmatpush3.msra.mxu1 %v804_v63  ;;  %2215 = vmatpush3.msra.mxu0 %v1250_v1 }
 0x1a1   :  { %2186 = vmatprep.mubr.msk.f32.mxu1 %vm2422_vm0, %v2421_v0  ;;  %2189 = vmatprep.subr.mxu1 %v2421_v0 }
 0x1a2   :  { %2216 = vmatprep.mubr.msk.f32.mxu0 %vm2422_vm0, %v2421_v0  ;;  %2219 = vmatprep.subr.mxu0 %v2421_v0 }
 0x1a6   :  { %2187 = vmatmul.mubr.f32.vlgmr.msra.gmra.mrb[0].mxu1 %v793_v44 }
 0x1a7   :  { %2190 = vmatpush3.msra.mxu1 %v727_v61  ;;  %2217 = vmatmul.mubr.f32.vlgmr.msra.gmra.mrb[2].mxu0 %v793_v44 }
 0x1a8   :  { %2220 = vmatpush3.msra.mxu0 %v1173_v62  ;;  %2191 = vmatprep.mubr.msk.f32.mxu1 %vm2422_vm0, %v2421_v0 }
 0x1a9   :  { %2194 = vmatprep.subr.mxu1 %v2421_v0  ;;  %2221 = vmatprep.mubr.msk.f32.mxu0 %vm2422_vm0, %v2421_v0 }
 0x1aa   :  { %2224 = vmatprep.subr.mxu0 %v2421_v0 }
 0x1ae   :  { %2192 = vmatmul.mubr.f32.vlgmr.msra.gmra.mrb[0].mxu1 %v794_v47 }
 0x1af   :  { %2195 = vmatpush3.msra.mxu1 %v805_v2  ;;  %2222 = vmatmul.mubr.f32.vlgmr.msra.gmra.mrb[2].mxu0 %v794_v47 }
 0x1b0   :  { %2225 = vmatpush3.msra.mxu0 %v1251_v3  ;;  %2196 = vmatprep.mubr.msk.f32.mxu1 %vm2422_vm0, %v2421_v0 }
 0x1b1   :  { %2199 = vmatprep.subr.mxu1 %v2421_v0  ;;  %2226 = vmatprep.mubr.msk.f32.mxu0 %vm2422_vm0, %v2421_v0 }
 0x1b2   :  { %2229 = vmatprep.subr.mxu0 %v2421_v0 }
 0x1b6   :  { %2197 = vmatmul.mubr.f32.vlgmr.msra.gmra.mrb[0].mxu1 %v2538_v41 }
 0x1b7   :  { %2200 = vmatpush3.msra.mxu1 %v727_v61  ;;  %2227 = vmatmul.mubr.f32.vlgmr.msra.gmra.mrb[2].mxu0 %v2538_v41 }
 0x1b8   :  { %2230 = vmatpush3.msra.mxu0 %v1173_v62  ;;  %2201 = vmatprep.mubr.msk.f32.mxu1 %vm2422_vm0, %v2421_v0 }
 0x1b9   :  { %2231 = vmatprep.mubr.msk.f32.mxu0 %vm2422_vm0, %v2421_v0  ;;  %2234 = vmatprep.subr.mxu1 %v2421_v0 }
 0x1be   :  { %2202 = vmatmul.mubr.f32.vlgmr.msra.gmra.mrb[0].mxu1 %v2538_v41 }
 0x1bf   :  { %2232 = vmatmul.mubr.f32.vlgmr.msra.gmra.mrb[2].mxu0 %v2538_v41  ;;  %2236 = vmatprep.mubr.msk.f32.mxu1 %vm2422_vm0, %v2421_v0 }
 0x291   :  { %v1168_v12 = vpop.f32.mrb[0].mxu1 }
 0x292   :  { %v1618_v13 = vmul.f32 %v1168_v12, %v1168_v12  ;;  %v1614_v14 = vpop.f32.mrb[2].mxu0  ;;  %v2203_v15 = vpop.f32.mrb[1].mxu1 }
 0x293   :  { %v1619_v17 = vmul.f32 %v1614_v14, %v1614_v14  ;;  %v2233_v19 = vpop.f32.mrb[3].mxu0 }
 0x295   :  { %v1620_v20 = vadd.f32 %v1619_v17, %v1618_v13 }
 0x297   :  { %v1626_v22 = vand.u32 4294901760, %v1620_v20 }
 0x299   :  { %v1703_v23 = vsub.f32 %v1620_v20, %v1626_v22  ;;  %2235 = vmatpush3.msra.mxu1 %v1626_v22 }
 0x29a   :  { %2237 = vmatmul.mubr.f32.vlgmr.msra.gmra.mrb[2].mxu1 %v1695_v21  ;;  %2239 = vmatprep.subr.mxu1 %v2421_v0 }
 0x29b   :  { %v1704_v25 = vand.u32 4294901760, %v1703_v23  ;;  %2241 = vmatprep.mubr.msk.f32.mxu1 %vm2422_vm0, %v2421_v0 }
 0x29d   :  { %v1705_v26 = vsub.f32 %v1703_v23, %v1704_v25 }
 0x29f   :  { %v1706_v27 = vand.u32 4294901760, %v1705_v26 }
 0x2a1   :  { %2240 = vmatpush3.msra.mxu1 %v1706_v27 }
 0x2a2   :  { %2242 = vmatmul.mubr.f32.vlgmr.msra.gmra.mrb[2].mxu1 %v1691_v9  ;;  %2244 = vmatprep.subr.mxu1 %v2421_v0 }
 0x2a3   :  { %2245 = vmatpush3.msra.mxu1 %v1703_v23  ;;  %2246 = vmatprep.mubr.msk.f32.mxu1 %vm2422_vm0, %v2421_v0 }
 0x2a4   :  { %2249 = vmatprep.subr.mxu1 %v2421_v0 }
 0x2aa   :  { %2247 = vmatmul.mubr.f32.vlgmr.msra.gmra.mrb[2].mxu1 %v1692_v10 }
 0x2ab   :  { %2250 = vmatpush3.msra.mxu1 %v1626_v22  ;;  %2251 = vmatprep.mubr.msk.f32.mxu1 %vm2422_vm0, %v2421_v0 }
 0x2ac   :  { %2254 = vmatprep.subr.mxu1 %v2421_v0 }
 0x2b2   :  { %2252 = vmatmul.mubr.f32.vlgmr.msra.gmra.mrb[2].mxu1 %v1693_v11 }
 0x2b3   :  { %2255 = vmatpush3.msra.mxu1 %v1704_v25  ;;  %2256 = vmatprep.mubr.msk.f32.mxu1 %vm2422_vm0, %v2421_v0 }
 0x2b4   :  { %2259 = vmatprep.subr.mxu1 %v2421_v0 }
 0x2ba   :  { %2257 = vmatmul.mubr.f32.vlgmr.msra.gmra.mrb[2].mxu1 %v1691_v9 }
 0x2bb   :  { %2260 = vmatpush3.msra.mxu1 %v1626_v22  ;;  %2261 = vmatprep.mubr.msk.f32.mxu1 %vm2422_vm0, %v2421_v0 }
 0x2c2   :  { %2262 = vmatmul.mubr.f32.vlgmr.msra.gmra.mrb[2].mxu1 %v1691_v9 }
 0x395   :  { %v2067_v28 = vpop.f32.mrb[2].mxu1 }
 0x396   :  { %2071 = vst [vmem:[#allocation9] sm:$0x1] %v2067_v28  ;;  %v2263_v29 = vpop.f32.mrb[3].mxu1 }
 0x397   :  { %2401 = shalt.err (!%p2398_p0)
}
 0x398   :  { %s2402_s29 = scalar_lea.hbm %s2616_s4, 16 }
 0x399   :  { %p2403_p1 = scmp.ne.s32.totalorder %s2616_s4, %s2402_s29  ;;  %p2406_p2 = scmp.lt.u32.totalorder %s2402_s29, %s2616_s4 }
 0x39b   :  { %p2408_p3 = pnand %p2406_p2, %p2403_p1 }
 0x39d   :  { %2411 = shalt.err (!%p2408_p3)
}
 0x39e   :  { %2081 = dma.vmem_to_hbm [thread:$0]  %s2079_s24, 16, %s2616_s4, [#allocation5]  }
 0x39f   :  { %2416 = dma.done.wait [#allocation5], 16  }
 0x3a0   :  { %2417 = vsyncadd [#allocation5], 4294967280 }
 0x3a1   :  { %2085 = vsyncpa [#allocation4], 1 }
 0x3a2   :  { %2086 = vsyncpa [#allocation7], 1 }
 0x3a3   :  { %2087 = vsyncpa [#allocation5], 1 }

</bundles_post_ra>
